<compile_context>
chip_gen: v5e
topology: v5e:2x2
jax: 0.10.0
libtpu: 0.0.40
codegen_flags: <defaults>
</compile_context>

<pallas_src>
import functools

import jax
import jax.numpy as jnp
from jax.experimental import pallas as pl
from jax.experimental.pallas import tpu as pltpu


def _round_up(n, m):
    return (n + m - 1) // m * m


def _vmem_budget_bytes():
    """Per-generation VMEM request ceiling (leave headroom below physical)."""
    kind = ""
    try:
        kind = jax.devices()[0].device_kind.lower()
    except Exception:
        pass
    if "v5" in kind or "v6" in kind:
        return 96 * 1024 * 1024          # v5e/v6e: 128 MiB physical VMEM
    return 48 * 1024 * 1024              # v7x (and unknown): 64 MiB physical


def _pick_batch_tile(B, D, dh, vmem_budget, param_bytes):
    """Pick a batch tile: big enough to amortize the ~0.35us per-grid-step
    overhead (~4 MiB of HBM I/O per step), small enough that the double
    buffered x/out tiles plus the live elementwise slabs fit the VMEM budget,
    and (for multi-tile batches) giving an even grid so both v7x TensorCores
    get work under dimension_semantics=("parallel",)."""
    Bp8 = _round_up(B, 8)
    io_row = 4 * (D + dh)                 # HBM bytes per row: x in + heads out
    live_row = 4 * (D + 3 * dh)           # x, z, exp/select temporaries, out
    tile_budget = max(1 << 20, vmem_budget - 2 * param_bytes - (6 << 20))
    vmem_rows = tile_budget // (2 * io_row + live_row)
    target_rows = (4 << 20) // io_row     # ~4 MiB of HBM traffic per step
    tile = max(8, (min(Bp8, vmem_rows, target_rows) // 8) * 8)
    if Bp8 > tile:
        n = -(-Bp8 // tile)
        if n % 2:                         # even grid -> both v7x TCs busy
            n += 1
        tile = max(8, _round_up(-(-Bp8 // n), 8))
    return tile


def dca_kernel(x_ref,
               w1_ref, b1_ref,
               w2_ref, b2_ref,
               w3_ref, b3_ref,
               wh_ref, bh_ref,
               *out_refs, d):
    x = x_ref[...]

    # Backbone MLP: three Linear + ReLU blocks (all on the MXU).
    h = jnp.dot(x, w1_ref[...], preferred_element_type=jnp.float32) + b1_ref[...]
    h = jnp.maximum(h, 0.0)
    h = jnp.dot(h, w2_ref[...], preferred_element_type=jnp.float32) + b2_ref[...]
    h = jnp.maximum(h, 0.0)
    h = jnp.dot(h, w3_ref[...], preferred_element_type=jnp.float32) + b3_ref[...]
    h = jnp.maximum(h, 0.0)

    # Single fused head matmul: columns [0,d)=avg, [d,2d)=pai, [2d,3d)=theta
    # (plus zero padding only when 3d was rounded up to a multiple of 128).
    z = jnp.dot(h, wh_ref[...], preferred_element_type=jnp.float32) + bh_ref[...]

    # Head nonlinearities with ONE exp pass through the (single-slot) EUP:
    #   exp heads:     exp(z)
    #   sigmoid head:  1 / (1 + exp(-z))   (exact reciprocal; the VPU divide
    #                                       hides under the memory bound)
    col = jax.lax.broadcasted_iota(jnp.int32, z.shape, 1)
    is_sigmoid = (col >= d) & (col < 2 * d)
    e = jnp.exp(jnp.where(is_sigmoid, -z, z))
    y = jnp.where(is_sigmoid, 1.0 / (1.0 + e), e)

    if len(out_refs) == 1:
        # Fused lane-dense slab; wrapper slices it into (m, p, t).
        out_refs[0][...] = y
    else:
        # d % 128 == 0: three lane-dense outputs taken from 128-aligned
        # slices of z (no padding written, no post-kernel slice copies).
        for i, o_ref in enumerate(out_refs):
            o_ref[...] = y[:, i * d:(i + 1) * d]


def dca_forward(x, params, *, batch_tile=None):
    """x: [B, D] float32. params: dict of weights/biases. Returns (m, p, t)."""
    B, D = x.shape

    w1, b1 = params["w1"], params["b1"]
    w2, b2 = params["w2"], params["b2"]
    w3, b3 = params["w3"], params["b3"]

    # Fuse the three head Linears into one wide matmul. If D is a multiple of
    # 128 each head's columns are already lane-aligned and the kernel writes
    # three unpadded outputs; otherwise pad up to one lane-dense slab.
    split_heads = (D % 128 == 0)
    dh = 3 * D if split_heads else _round_up(3 * D, 128)
    wh = jnp.concatenate([params["wa"], params["wp"], params["wt"]], axis=1)
    bh = jnp.concatenate([params["ba"], params["bp"], params["bt"]], axis=1)
    if dh != 3 * D:
        pad = dh - 3 * D
        wh = jnp.pad(wh, ((0, 0), (0, pad)))
        bh = jnp.pad(bh, ((0, 0), (0, pad)))

    param_arrays = (w1, b1, w2, b2, w3, b3, wh, bh)
    param_bytes = sum(4 * a.size for a in param_arrays)
    budget = _vmem_budget_bytes()

    if batch_tile is None:
        batch_tile = _pick_batch_tile(B, D, dh, budget, param_bytes)
    batch_tile = max(8, min(_round_up(batch_tile, 8), _round_up(B, 8)))
    Bp = _round_up(B, batch_tile)
    xp = x if Bp == B else jnp.pad(x, ((0, Bp - B), (0, 0)))
    grid = Bp // batch_tile

    def full_spec(arr):
        # Whole (small) parameter array resident in VMEM every grid step.
        # NOTE: constant-index blocks are still double-buffered by default;
        # pl.Buffered(1) would halve their footprint, but the win is marginal
        # at these parameter sizes so we keep the default for robustness.
        return pl.BlockSpec(arr.shape, lambda i: (0,) * arr.ndim)

    x_spec = pl.BlockSpec((batch_tile, D), lambda i: (i, 0))
    if split_heads:
        out_shape = tuple(jax.ShapeDtypeStruct((Bp, D), jnp.float32)
                          for _ in range(3))
        out_specs = tuple(pl.BlockSpec((batch_tile, D), lambda i: (i, 0))
                          for _ in range(3))
    else:
        out_shape = jax.ShapeDtypeStruct((Bp, dh), jnp.float32)
        out_specs = pl.BlockSpec((batch_tile, dh), lambda i: (i, 0))

    # VMEM request: (double-buffered) resident params, double-buffered x and
    # output tiles, plus the slab-sized elementwise intermediates that live
    # alongside them (z, exp result, selected output), with headroom; capped
    # at the per-generation budget (48 MiB on v7x, 96 MiB on v5e/v6e).
    io_tile = 4 * batch_tile * (D + dh)
    live_tile = 4 * batch_tile * 3 * dh
    need = 2 * param_bytes + 2 * io_tile + live_tile + (4 << 20)
    vmem_limit = int(min(budget, max(32 << 20, need)))

    grid_spec = pltpu.PrefetchScalarGridSpec(
        num_scalar_prefetch=0,
        grid=(grid,),
        in_specs=[x_spec] + [full_spec(a) for a in param_arrays],
        out_specs=out_specs,
    )

    out = pl.pallas_call(
        functools.partial(dca_kernel, d=D),
        out_shape=out_shape,
        grid_spec=grid_spec,
        compiler_params=pltpu.CompilerParams(
            dimension_semantics=("parallel",),
            vmem_limit_bytes=vmem_limit),
    )(xp, *param_arrays)

    if split_heads:
        m, p, t = out
        if Bp != B:
            m, p, t = m[:B], p[:B], t[:B]
    else:
        m = out[:B, :D]
        p = out[:B, D:2 * D]
        t = out[:B, 2 * D:3 * D]
    return m, p, t


def init_params(key, input_size):
    """Deterministic synthetic init mimicking PyTorch Linear default
    (uniform(-1/sqrt(fan_in), 1/sqrt(fan_in)))."""
    def linear(key, fan_in, fan_out):
        kw, kb = jax.random.split(key)
        bound = 1.0 / jnp.sqrt(fan_in)
        # weight stored as [in, out] (transposed vs. PyTorch [out, in])
        w = jax.random.uniform(kw, (fan_in, fan_out), jnp.float32, -bound, bound)
        b = jax.random.uniform(kb, (1, fan_out), jnp.float32, -bound, bound)
        return w, b

    keys = jax.random.split(key, 6)
    p = {}
    p["w1"], p["b1"] = linear(keys[0], input_size, 64)
    p["w2"], p["b2"] = linear(keys[1], 64, 32)
    p["w3"], p["b3"] = linear(keys[2], 32, 64)
    p["wa"], p["ba"] = linear(keys[3], 64, input_size)
    p["wp"], p["bp"] = linear(keys[4], 64, input_size)
    p["wt"], p["bt"] = linear(keys[5], 64, input_size)
    return p


def dca_ref(x, params):
    """Pure-JAX reference for correctness check."""
    h = jnp.maximum(x @ params["w1"] + params["b1"], 0.0)
    h = jnp.maximum(h @ params["w2"] + params["b2"], 0.0)
    h = jnp.maximum(h @ params["w3"] + params["b3"], 0.0)
    m = jnp.exp(h @ params["wa"] + params["ba"])
    p = jax.nn.sigmoid(h @ params["wp"] + params["bp"])
    t = jnp.exp(h @ params["wt"] + params["bt"])
    return m, p, t


if __name__ == "__main__":
    key = jax.random.PRNGKey(0)
    k_params, k_x, k_params2, k_x2 = jax.random.split(key, 4)

    # Case 1: D not a multiple of 128 -> fused lane-dense slab path.
    batch, input_size = 16, 32
    params = init_params(k_params, input_size)
    x = jax.random.normal(k_x, (batch, input_size), jnp.float32)
    m, p, t = dca_forward(x, params)
    jax.block_until_ready((m, p, t))
    m_ref, p_ref, t_ref = dca_ref(x, params)
    assert jnp.allclose(m, m_ref, rtol=1e-5, atol=1e-5)
    assert jnp.allclose(p, p_ref, rtol=1e-5, atol=1e-5)
    assert jnp.allclose(t, t_ref, rtol=1e-5, atol=1e-5)

    # Case 2: D % 128 == 0 -> three separate lane-dense outputs
    # (no padding columns, no post-kernel column-slice copies).
    batch2, input_size2 = 24, 128
    params2 = init_params(k_params2, input_size2)
    x2 = jax.random.normal(k_x2, (batch2, input_size2), jnp.float32)
    m2, p2, t2 = dca_forward(x2, params2)
    jax.block_until_ready((m2, p2, t2))
    m2_ref, p2_ref, t2_ref = dca_ref(x2, params2)
    assert jnp.allclose(m2, m2_ref, rtol=1e-5, atol=1e-5)
    assert jnp.allclose(p2, p2_ref, rtol=1e-5, atol=1e-5)
    assert jnp.allclose(t2, t2_ref, rtol=1e-5, atol=1e-5)

    print("KERNEL_OK")
</pallas_src>

<mosaic_0001>
module attributes {stable_mosaic.version = 11 : i64} {
  func.func @dca_kernel(%arg0: i32, %arg1: memref<16x32xf32, #tpu.memory_space<vmem>>, %arg2: memref<32x64xf32, #tpu.memory_space<vmem>>, %arg3: memref<1x64xf32, #tpu.memory_space<vmem>>, %arg4: memref<64x32xf32, #tpu.memory_space<vmem>>, %arg5: memref<1x32xf32, #tpu.memory_space<vmem>>, %arg6: memref<32x64xf32, #tpu.memory_space<vmem>>, %arg7: memref<1x64xf32, #tpu.memory_space<vmem>>, %arg8: memref<64x128xf32, #tpu.memory_space<vmem>>, %arg9: memref<1x128xf32, #tpu.memory_space<vmem>>, %arg10: memref<16x128xf32, #tpu.memory_space<vmem>>) attributes {dimension_semantics = [#tpu.dimension_semantics<parallel>], iteration_bounds = array<i64: 1>, scalar_prefetch = 0 : i64, scratch_operands = 0 : i64, tpu.core_type = #tpu.core_type<tc>, window_params = [{transform_indices = @transform_0, window_bounds = array<i64: 16, 32>}, {pipeline_mode = #tpu.pipeline_mode<synchronous>, transform_indices = @transform_1, window_bounds = array<i64: 32, 64>}, {pipeline_mode = #tpu.pipeline_mode<synchronous>, transform_indices = @transform_2, window_bounds = array<i64: 1, 64>}, {pipeline_mode = #tpu.pipeline_mode<synchronous>, transform_indices = @transform_3, window_bounds = array<i64: 64, 32>}, {pipeline_mode = #tpu.pipeline_mode<synchronous>, transform_indices = @transform_4, window_bounds = array<i64: 1, 32>}, {pipeline_mode = #tpu.pipeline_mode<synchronous>, transform_indices = @transform_5, window_bounds = array<i64: 32, 64>}, {pipeline_mode = #tpu.pipeline_mode<synchronous>, transform_indices = @transform_6, window_bounds = array<i64: 1, 64>}, {pipeline_mode = #tpu.pipeline_mode<synchronous>, transform_indices = @transform_7, window_bounds = array<i64: 64, 128>}, {pipeline_mode = #tpu.pipeline_mode<synchronous>, transform_indices = @transform_8, window_bounds = array<i64: 1, 128>}, {transform_indices = @transform_9, window_bounds = array<i64: 16, 128>}]} {
    %c0 = arith.constant 0 : index
    %c0_0 = arith.constant 0 : index
    %0 = vector.load %arg1[%c0, %c0_0] : memref<16x32xf32, #tpu.memory_space<vmem>>, vector<16x32xf32>
    %c0_1 = arith.constant 0 : index
    %c0_2 = arith.constant 0 : index
    %1 = vector.load %arg2[%c0_1, %c0_2] : memref<32x64xf32, #tpu.memory_space<vmem>>, vector<32x64xf32>
    %cst = arith.constant dense<0.000000e+00> : vector<16x64xf32>
    %2 = tpu.matmul %0, %1, %cst {dimension_numbers = #tpu.dot_dimension_numbers<[1], [0], [0], [1], [0, 0, 1, 1], [], []>} : vector<16x32xf32>, vector<32x64xf32>, vector<16x64xf32> -> vector<16x64xf32>
    %c0_3 = arith.constant 0 : index
    %c0_4 = arith.constant 0 : index
    %3 = vector.load %arg3[%c0_3, %c0_4] : memref<1x64xf32, #tpu.memory_space<vmem>>, vector<1x64xf32>
    %4 = vector.broadcast %3 : vector<1x64xf32> to vector<16x64xf32>
    %5 = arith.addf %2, %4 : vector<16x64xf32>
    %cst_5 = arith.constant 0.000000e+00 : f32
    %6 = vector.broadcast %cst_5 : f32 to vector<16x64xf32>
    %7 = arith.maximumf %5, %6 : vector<16x64xf32>
    %c0_6 = arith.constant 0 : index
    %c0_7 = arith.constant 0 : index
    %8 = vector.load %arg4[%c0_6, %c0_7] : memref<64x32xf32, #tpu.memory_space<vmem>>, vector<64x32xf32>
    %cst_8 = arith.constant dense<0.000000e+00> : vector<16x32xf32>
    %9 = tpu.matmul %7, %8, %cst_8 {dimension_numbers = #tpu.dot_dimension_numbers<[1], [0], [0], [1], [0, 0, 1, 1], [], []>} : vector<16x64xf32>, vector<64x32xf32>, vector<16x32xf32> -> vector<16x32xf32>
    %c0_9 = arith.constant 0 : index
    %c0_10 = arith.constant 0 : index
    %10 = vector.load %arg5[%c0_9, %c0_10] : memref<1x32xf32, #tpu.memory_space<vmem>>, vector<1x32xf32>
    %11 = vector.broadcast %10 : vector<1x32xf32> to vector<16x32xf32>
    %12 = arith.addf %9, %11 : vector<16x32xf32>
    %cst_11 = arith.constant 0.000000e+00 : f32
    %13 = vector.broadcast %cst_11 : f32 to vector<16x32xf32>
    %14 = arith.maximumf %12, %13 : vector<16x32xf32>
    %c0_12 = arith.constant 0 : index
    %c0_13 = arith.constant 0 : index
    %15 = vector.load %arg6[%c0_12, %c0_13] : memref<32x64xf32, #tpu.memory_space<vmem>>, vector<32x64xf32>
    %cst_14 = arith.constant dense<0.000000e+00> : vector<16x64xf32>
    %16 = tpu.matmul %14, %15, %cst_14 {dimension_numbers = #tpu.dot_dimension_numbers<[1], [0], [0], [1], [0, 0, 1, 1], [], []>} : vector<16x32xf32>, vector<32x64xf32>, vector<16x64xf32> -> vector<16x64xf32>
    %c0_15 = arith.constant 0 : index
    %c0_16 = arith.constant 0 : index
    %17 = vector.load %arg7[%c0_15, %c0_16] : memref<1x64xf32, #tpu.memory_space<vmem>>, vector<1x64xf32>
    %18 = vector.broadcast %17 : vector<1x64xf32> to vector<16x64xf32>
    %19 = arith.addf %16, %18 : vector<16x64xf32>
    %cst_17 = arith.constant 0.000000e+00 : f32
    %20 = vector.broadcast %cst_17 : f32 to vector<16x64xf32>
    %21 = arith.maximumf %19, %20 : vector<16x64xf32>
    %c0_18 = arith.constant 0 : index
    %c0_19 = arith.constant 0 : index
    %22 = vector.load %arg8[%c0_18, %c0_19] : memref<64x128xf32, #tpu.memory_space<vmem>>, vector<64x128xf32>
    %cst_20 = arith.constant dense<0.000000e+00> : vector<16x128xf32>
    %23 = tpu.matmul %21, %22, %cst_20 {dimension_numbers = #tpu.dot_dimension_numbers<[1], [0], [0], [1], [0, 0, 1, 1], [], []>} : vector<16x64xf32>, vector<64x128xf32>, vector<16x128xf32> -> vector<16x128xf32>
    %c0_21 = arith.constant 0 : index
    %c0_22 = arith.constant 0 : index
    %24 = vector.load %arg9[%c0_21, %c0_22] : memref<1x128xf32, #tpu.memory_space<vmem>>, vector<1x128xf32>
    %25 = vector.broadcast %24 : vector<1x128xf32> to vector<16x128xf32>
    %26 = arith.addf %23, %25 : vector<16x128xf32>
    %27 = tpu.iota {dimensions = array<i32: 1>} : vector<16x128xi32>
    %c32_i32 = arith.constant 32 : i32
    %28 = vector.broadcast %c32_i32 : i32 to vector<16x128xi32>
    %29 = arith.cmpi sge, %27, %28 : vector<16x128xi32>
    %c64_i32 = arith.constant 64 : i32
    %30 = vector.broadcast %c64_i32 : i32 to vector<16x128xi32>
    %31 = arith.cmpi slt, %27, %30 : vector<16x128xi32>
    %32 = arith.andi %29, %31 : vector<16x128xi1>
    %cst_23 = arith.constant 0.000000e+00 : f32
    %33 = vector.broadcast %cst_23 : f32 to vector<16x128xf32>
    %34 = arith.subf %33, %26 : vector<16x128xf32>
    %35 = arith.select %32, %34, %26 : vector<16x128xi1>, vector<16x128xf32>
    %36 = math.exp %35 : vector<16x128xf32>
    %cst_24 = arith.constant 1.000000e+00 : f32
    %37 = vector.broadcast %cst_24 : f32 to vector<16x128xf32>
    %38 = arith.addf %37, %36 : vector<16x128xf32>
    %cst_25 = arith.constant 1.000000e+00 : f32
    %39 = vector.broadcast %cst_25 : f32 to vector<16x128xf32>
    %40 = arith.divf %39, %38 : vector<16x128xf32>
    %41 = arith.select %32, %40, %36 : vector<16x128xi1>, vector<16x128xf32>
    %c0_26 = arith.constant 0 : index
    %c0_27 = arith.constant 0 : index
    %42 = vector.load %arg10[%c0_26, %c0_27] : memref<16x128xf32, #tpu.memory_space<vmem>>, vector<16x128xf32>
    tpu.vector_store %arg10[%c0_26, %c0_27], %41 {strides = array<i32>} : memref<16x128xf32, #tpu.memory_space<vmem>>, vector<16x128xf32>,
    return
  }
  func.func @transform_0(%arg0: i32) -> (i32, i32) {
    %c0_i32 = arith.constant 0 : i32
    %c0_i32_0 = arith.constant 0 : i32
    return %arg0, %c0_i32 : i32, i32
  }
  func.func @transform_1(%arg0: i32) -> (i32, i32) {
    %c0_i32 = arith.constant 0 : i32
    %c0_i32_0 = arith.constant 0 : i32
    %c0_i32_1 = arith.constant 0 : i32
    return %c0_i32, %c0_i32_0 : i32, i32
  }
  func.func @transform_2(%arg0: i32) -> (i32, i32) {
    %c0_i32 = arith.constant 0 : i32
    %c0_i32_0 = arith.constant 0 : i32
    %c0_i32_1 = arith.constant 0 : i32
    return %c0_i32, %c0_i32_0 : i32, i32
  }
  func.func @transform_3(%arg0: i32) -> (i32, i32) {
    %c0_i32 = arith.constant 0 : i32
    %c0_i32_0 = arith.constant 0 : i32
    %c0_i32_1 = arith.constant 0 : i32
    return %c0_i32, %c0_i32_0 : i32, i32
  }
  func.func @transform_4(%arg0: i32) -> (i32, i32) {
    %c0_i32 = arith.constant 0 : i32
    %c0_i32_0 = arith.constant 0 : i32
    %c0_i32_1 = arith.constant 0 : i32
    return %c0_i32, %c0_i32_0 : i32, i32
  }
  func.func @transform_5(%arg0: i32) -> (i32, i32) {
    %c0_i32 = arith.constant 0 : i32
    %c0_i32_0 = arith.constant 0 : i32
    %c0_i32_1 = arith.constant 0 : i32
    return %c0_i32, %c0_i32_0 : i32, i32
  }
  func.func @transform_6(%arg0: i32) -> (i32, i32) {
    %c0_i32 = arith.constant 0 : i32
    %c0_i32_0 = arith.constant 0 : i32
    %c0_i32_1 = arith.constant 0 : i32
    return %c0_i32, %c0_i32_0 : i32, i32
  }
  func.func @transform_7(%arg0: i32) -> (i32, i32) {
    %c0_i32 = arith.constant 0 : i32
    %c0_i32_0 = arith.constant 0 : i32
    %c0_i32_1 = arith.constant 0 : i32
    return %c0_i32, %c0_i32_0 : i32, i32
  }
  func.func @transform_8(%arg0: i32) -> (i32, i32) {
    %c0_i32 = arith.constant 0 : i32
    %c0_i32_0 = arith.constant 0 : i32
    %c0_i32_1 = arith.constant 0 : i32
    return %c0_i32, %c0_i32_0 : i32, i32
  }
  func.func @transform_9(%arg0: i32) -> (i32, i32) {
    %c0_i32 = arith.constant 0 : i32
    %c0_i32_0 = arith.constant 0 : i32
    return %arg0, %c0_i32 : i32, i32
  }
}

</mosaic_0001>

<bundles_post_ra>
// kernel: tpu_custom_call.1
= control target key start
LH: loop header
LB: loop body
LE: loop exit
PB: predicated region body
PF: predicated region fallthrough
CT: control target
= control target key end

     0   :  { %14 = vsyncpa [#allocation3], 0  ;;  %s568_s0 = inlined_call_operand.hbm [shape: f32[16,32], index: 0, kind: input, shape index: {}]   ;;  %s569_s1 = inlined_call_operand.vmem [shape: f32[32,64], index: 1, kind: input, shape index: {}]   ;;  %s570_s2 = inlined_call_operand.vmem [shape: f32[1,64], index: 2, kind: input, shape index: {}]   ;;  %s571_s3 = inlined_call_operand.vmem [shape: f32[64,32], index: 3, kind: input, shape index: {}]   ;;  %s572_s4 = inlined_call_operand.vmem [shape: f32[1,32], index: 4, kind: input, shape index: {}]   ;;  %s573_s5 = inlined_call_operand.hbm [shape: f32[32,64], index: 5, kind: input, shape index: {}]   ;;  %s574_s6 = inlined_call_operand.vmem [shape: f32[1,64], index: 6, kind: input, shape index: {}]   ;;  %s575_s7 = inlined_call_operand.vmem [shape: f32[64,128], index: 7, kind: input, shape index: {}]   ;;  %s576_s8 = inlined_call_operand.vmem [shape: f32[1,128], index: 8, kind: input, shape index: {}]   ;;  %s577_s9 = inlined_call_operand.hbm [shape: f32[16,128], index: 9, kind: output, shape index: {}]  }
   0x1   :  { %15 = vsyncpa [#allocation6], 0 }
   0x2   :  { %16 = vsyncpa [#allocation4], 0  ;;  %s21_s11 = sshll.u32 %s568_s0, 4  ;;  %s403_s12 = smov [#allocation2]   ;;  %s22_s11 = int_to_ptr.hbm [resolvable:$true] %s21_s11 }
   0x3   :  { %s23_s13 = sshll.u32 %s403_s12, 4  ;;  %s42_s16 = sshll.u32 %s573_s5, 4  ;;  %s24_s13 = int_to_ptr.vmem [resolvable:$true] %s23_s13  ;;  %s43_s16 = int_to_ptr.hbm [resolvable:$true] %s42_s16 }
   0x4   :  { %s404_s17 = smov 128   ;;  %s405_s18 = smov 8  }
   0x5   :  { %29 = dma.hbm_to_vmem [thread:$0]  %s22_s11, 256, %s24_s13, [#allocation3], %s404_s17, %s404_s17, %s405_s18  }
   0x6   :  { %s406_s19 = smov [#allocation5]  }
   0x7   :  { %s44_s20 = sshll.u32 %s406_s19, 4  ;;  %s45_s20 = int_to_ptr.vmem [resolvable:$true] %s44_s20 }
   0x8   :  { %50 = dma.hbm_to_vmem [thread:$0]  %s43_s16, 512, %s45_s20, [#allocation6], %s404_s17, %s404_s17, %s405_s18  }
   0x9   :  { %397 = dma.done.wait [#allocation3], 256  }
   0xa   :  { %398 = vsyncadd [#allocation3], 4294967040 }
   0xb   :  { %399 = dma.done.wait [#allocation6], 512  }
   0xc   :  { %400 = vsyncadd [#allocation6], 4294966784  ;;  %v70_v0 = vld [vmem:[%s569_s1 + $0x18] sm:$0xff]  ;;  %v69_v1 = vld [vmem:[%s569_s1 + $0x10] sm:$0xff]  ;;  %vm75_vm0 = vcmask 261120   ;;  %vm119_vm1 = vcmask 523264   ;;  %v231_v47 = vlaneseq }
   0xd   :  { %94 = vmatpush.msra.mxu0 %v70_v0  ;;  %v68_v2 = vld [vmem:[%s569_s1 + $0x8] sm:$0xff]  ;;  %v114_v3 = vld [vmem:[%s571_s3 + $0x38] sm:$0xff]  ;;  %v113_v4 = vld [vmem:[%s571_s3 + $0x30] sm:$0xff]  ;;  %s286_s21 = sshll.u32 %s577_s9, 4  ;;  %s287_s21 = int_to_ptr.hbm [resolvable:$true] %s286_s21 }
   0xe   :  { %v67_v5 = vld [vmem:[%s569_s1] sm:$0xff]  ;;  %134 = vmatpush.msra.mxu1 %v114_v3  ;;  %v112_v6 = vld [vmem:[%s571_s3 + $0x28] sm:$0xff]  ;;  %v110_v9 = vld [vmem:[%s571_s3 + $0x18] sm:$0xff]  ;;  %v232_v48 = vand.u32 127, %v231_v47 }
   0xf   :  { %95 = vmatpush.msra.mxu0 %v69_v1  ;;  %v65_v7 = vld [vmem:[#allocation2] sm:$0xff]  ;;  %v66_v10 = vld [vmem:[#allocation2 + $0x8] sm:$0xff]  ;;  %v109_v11 = vld [vmem:[%s571_s3 + $0x10] sm:$0xff] }
  0x10   :  { %135 = vmatpush.msra.mxu1 %v113_v4  ;;  %v111_v8 = vld [vmem:[%s571_s3 + $0x20] sm:$0xff]  ;;  %v108_v12 = vld [vmem:[%s571_s3 + $0x8] sm:$0xff]  ;;  %v152_v23 = vld [vmem:[#allocation5 + $0x8] sm:$0xff]  ;;  %vm233_vm2 = vcmp.ge.s32.totalorder %v232_v48, 32  ;;  %vm234_vm3 = vcmp.lt.s32.totalorder %v232_v48, 64 }
  0x11   :  { %96 = vmatpush.msra.mxu0 %v68_v2  ;;  %v107_v13 = vld [vmem:[%s571_s3] sm:$0xff]  ;;  %v154_v14 = vld [vmem:[#allocation5 + $0x18] sm:$0xff]  ;;  %v151_v24 = vld [vmem:[#allocation5] sm:$0xff] }
  0x12   :  { %136 = vmatpush.msra.mxu1 %v112_v6  ;;  %177 = vmatpush.msra.mxu2 %v154_v14  ;;  %v313_v15 = vld [vmem:[%s570_s2] ss:$0 sm:$0xff]  ;;  %v197_v25 = vld [vmem:[%s575_s7 + $0x38] sm:$0xff]  ;;  %v196_v26 = vld [vmem:[%s575_s7 + $0x30] sm:$0xff] }
  0x13   :  { %97 = vmatpush.msra.mxu0 %v67_v5  ;;  %v153_v22 = vld [vmem:[#allocation5 + $0x10] sm:$0xff]  ;;  %216 = vmatpush.msra.mxu3 %v197_v25  ;;  %v195_v27 = vld [vmem:[%s575_s7 + $0x28] sm:$0xff]  ;;  %v193_v29 = vld [vmem:[%s575_s7 + $0x18] sm:$0xff] }
  0x14   :  { %300 = vmatmul.msk.f32.vlgmr.msra.gmra.mxu0 %vm75_vm0, %v65_v7  ;;  %137 = vmatpush.msra.mxu1 %v111_v8  ;;  %v194_v28 = vld [vmem:[%s575_s7 + $0x20] sm:$0xff]  ;;  %v192_v37 = vld [vmem:[%s575_s7 + $0x10] sm:$0xff]  ;;  %v191_v38 = vld [vmem:[%s575_s7 + $0x8] sm:$0xff] }
  0x15   :  { %178 = vmatpush.msra.mxu2 %v153_v22  ;;  %217 = vmatpush.msra.mxu3 %v196_v26  ;;  %v314_v30 = vld [vmem:[%s572_s4] ss:$0 sm:$0xff]  ;;  %vm550_vm4 = vmand %vm233_vm2, %vm234_vm3 }
  0x16   :  { %138 = vmatpush.msra.mxu1 %v110_v9  ;;  %v190_v39 = vld [vmem:[%s575_s7] sm:$0xff] }
  0x17   :  { %179 = vmatpush.msra.mxu2 %v152_v23  ;;  %218 = vmatpush.msra.mxu3 %v195_v27  ;;  %v315_v40 = vld [vmem:[%s574_s6] ss:$0 sm:$0xff]  ;;  %s407_s6 = smov [#allocation7]  }
  0x18   :  { %139 = vmatpush.msra.mxu1 %v109_v11  ;;  %v316_v49 = vld [vmem:[%s576_s8] ss:$0 sm:$0xff]  ;;  %s284_s7 = sshll.u32 %s407_s6, 4  ;;  %s285_s7 = int_to_ptr.vmem [resolvable:$true] %s284_s7 }
  0x19   :  { %180 = vmatpush.msra.mxu2 %v151_v24  ;;  %219 = vmatpush.msra.mxu3 %v194_v28 }
  0x1a   :  { %140 = vmatpush.msra.mxu1 %v108_v12 }
  0x1b   :  { %220 = vmatpush.msra.mxu3 %v193_v29 }
  0x1c   :  { %301 = vmatmul.msk.f32.gmra.mxu0 %vm75_vm0, %v66_v10  ;;  %141 = vmatpush.msra.mxu1 %v107_v13 }
  0x1d   :  { %221 = vmatpush.msra.mxu3 %v192_v37 }
  0x1f   :  { %222 = vmatpush.msra.mxu3 %v191_v38 }
  0x21   :  { %223 = vmatpush.msra.mxu3 %v190_v39 }
  0x91   :  { %v99_v16 = vpop.f32.mrf.mxu0 }
  0x92   :  { %v100_v17 = vadd.f32 %v313_v15, %v99_v16 }
  0x94   :  { %v105_v18 = vmax.f32 %v100_v17, 0.0 }
  0x96   :  { %302 = vmatmul.msk.f32.vlgmr.msra.gmra.mxu1 %vm119_vm1, %v105_v18 }
  0x99   :  { %v102_v19 = vpop.f32.mrf.mxu0 }
  0x9a   :  { %v103_v20 = vadd.f32 %v313_v15, %v102_v19 }
  0x9c   :  { %v106_v21 = vmax.f32 %v103_v20, 0.0 }
  0x9e   :  { %303 = vmatmul.msk.f32.gmra.mxu1 %vm119_vm1, %v106_v21 }
 0x113   :  { %v143_v31 = vpop.f32.mrf.mxu1 }
 0x114   :  { %v144_v32 = vadd.f32 %v314_v30, %v143_v31 }
 0x116   :  { %v149_v33 = vmax.f32 %v144_v32, 0.0 }
 0x118   :  { %304 = vmatmul.msk.f32.vlgmr.msra.gmra.mxu2 %vm75_vm0, %v149_v33 }
 0x11b   :  { %v146_v34 = vpop.f32.mrf.mxu1 }
 0x11c   :  { %v147_v35 = vadd.f32 %v314_v30, %v146_v34 }
 0x11e   :  { %v150_v36 = vmax.f32 %v147_v35, 0.0 }
 0x120   :  { %305 = vmatmul.msk.f32.gmra.mxu2 %vm75_vm0, %v150_v36 }
 0x19b   :  { %v182_v41 = vpop.f32.mrf.mxu2 }
 0x19c   :  { %v183_v42 = vadd.f32 %v315_v40, %v182_v41 }
 0x19e   :  { %v188_v43 = vmax.f32 %v183_v42, 0.0 }
 0x1a0   :  { %306 = vmatmul.msk.f32.vlgmr.msra.gmra.mxu3 %vm119_vm1, %v188_v43 }
 0x1a3   :  { %v185_v44 = vpop.f32.mrf.mxu2 }
 0x1a4   :  { %v186_v45 = vadd.f32 %v315_v40, %v185_v44 }
 0x1a6   :  { %v189_v46 = vmax.f32 %v186_v45, 0.0 }
 0x1a8   :  { %307 = vmatmul.msk.f32.gmra.mxu3 %vm119_vm1, %v189_v46 }
 0x223   :  { %v225_v50 = vpop.f32.mrf.mxu3 }
 0x224   :  { %v226_v51 = vadd.f32 %v316_v49, %v225_v50 }
 0x226   :  { %v236_v53 = vsub.f32 0.0, %v226_v51 }
 0x228   :  { %v238_v54 = vsel %vm550_vm4, %v236_v53, %v226_v51 }
 0x229   :  { %v240_v55 = vmul.f32 1.442695, %v238_v54 }
 0x22b   :  { %317 = vpow2.f32 %v240_v55  ;;  %v228_v56 = vpop.f32.mrf.mxu3 }
 0x22c   :  { %v229_v57 = vadd.f32 %v316_v49, %v228_v56 }
 0x22e   :  { %v237_v58 = vsub.f32 0.0, %v229_v57 }
 0x230   :  { %v239_v59 = vsel %vm550_vm4, %v237_v58, %v229_v57 }
 0x231   :  { %v318_v60 = vpop.eup %317  ;;  %v242_v61 = vmul.f32 1.442695, %v239_v59 }
 0x232   :  { %v244_v62 = vadd.f32 1.0, %v318_v60 }
 0x233   :  { %319 = vpow2.f32 %v242_v61 }
 0x234   :  { %321 = vrcp.f32 %v244_v62  ;;  %v257_v4 = vand.u32 2147483648, %v244_v62  ;;  %v255_v6 = vand.u32 2147483647, %v244_v62  ;;  %vm251_vm6 = vweird.f32 %v244_v62 }
 0x236   :  { %v258_v9 = vor.u32 1.1754944e-38, %v257_v4  ;;  %vm256_vm8 = vcmp.eq.f32.partialorder %v255_v6, 8.507059e+37 }
 0x239   :  { %v320_v63 = vpop.eup %319 }
 0x23a   :  { %v322_v0 = vpop.eup %321  ;;  %v245_v1 = vadd.f32 1.0, %v320_v63 }
 0x23b   :  { %v247_v2 = vmul.f32 %v322_v0, %v244_v62  ;;  %vm252_vm5 = vweird.f32 %v322_v0 }
 0x23c   :  { %323 = vrcp.f32 %v245_v1  ;;  %vm253_vm7 = vmor %vm251_vm6, %vm252_vm5  ;;  %v272_v15 = vand.u32 2147483648, %v245_v1  ;;  %v270_v17 = vand.u32 2147483647, %v245_v1  ;;  %vm266_vm10 = vweird.f32 %v245_v1 }
 0x23d   :  { %v248_v3 = vsub.f32 1.0, %v247_v2 }
 0x23e   :  { %v273_v19 = vor.u32 1.1754944e-38, %v272_v15  ;;  %vm271_vm12 = vcmp.eq.f32.partialorder %v270_v17, 8.507059e+37 }
 0x23f   :  { %v249_v5 = vmul.f32 %v322_v0, %v248_v3 }
 0x241   :  { %v250_v7 = vadd.f32 %v322_v0, %v249_v5 }
 0x242   :  { %v324_v8 = vpop.eup %323 }
 0x243   :  { %v254_v10 = vsel %vm253_vm7, %v322_v0, %v250_v7  ;;  %v262_v11 = vmul.f32 %v324_v8, %v245_v1  ;;  %vm267_vm9 = vweird.f32 %v324_v8 }
 0x244   :  { %v259_v12 = vsel %vm256_vm8, %v258_v9, %v254_v10  ;;  %vm268_vm11 = vmor %vm266_vm10, %vm267_vm9 }
 0x245   :  { %v263_v13 = vsub.f32 1.0, %v262_v11  ;;  %v276_v14 = vsel %vm550_vm4, %v259_v12, %v318_v60 }
 0x246   :  { %278 = vst [vmem:[#allocation7] sm:$0xff] %v276_v14 }
 0x247   :  { %v264_v16 = vmul.f32 %v324_v8, %v263_v13 }
 0x249   :  { %v265_v18 = vadd.f32 %v324_v8, %v264_v16 }
 0x24b   :  { %v269_v20 = vsel %vm268_vm11, %v324_v8, %v265_v18 }
 0x24c   :  { %v274_v21 = vsel %vm271_vm12, %v273_v19, %v269_v20 }
 0x24d   :  { %v277_v22 = vsel %vm550_vm4, %v274_v21, %v320_v63 }
 0x24e   :  { %279 = vst [vmem:[#allocation7 + $0x8] sm:$0xff] %v277_v22 }
 0x24f   :  { %292 = dma.vmem_to_hbm [thread:$0]  %s285_s7, 256, %s287_s21, [#allocation4], %s404_s17, %s404_s17, %s405_s18  }
 0x250   :  { %401 = dma.done.wait [#allocation4], 256  }
 0x251   :  { %402 = vsyncadd [#allocation4], 4294967040 }
 0x252   :  { %297 = vsyncpa [#allocation3], 1 }
 0x253   :  { %298 = vsyncpa [#allocation6], 1 }
 0x254   :  { %299 = vsyncpa [#allocation4], 1 }

</bundles_post_ra>
